<compile_context>
chip_gen: v6e
topology: v6e:2x2x1
jax: 0.10.0
libtpu: 0.0.40
codegen_flags: <defaults>
</compile_context>

<pallas_src>
import jax
import jax.numpy as jnp
from jax.experimental import pallas as pl
from jax.experimental.pallas import tpu as pltpu


def _round_up(x, m):
    return ((x + m - 1) // m) * m


def residual_block_kernel(x_ref, wt_ref, b_ref, o_ref):
    # x_ref:  (TB, Dp)  input batch tile (native dtype)
    # wt_ref: (Dp, Dp)  weight, transposed to (in, out), resident across tiles
    # b_ref:  (1, Dp)   bias (f32)
    # o_ref:  (TB, Dp)  output tile
    x = x_ref[...]
    # MXU matmul in native operand dtype, f32 accumulate.
    z = jnp.dot(x, wt_ref[...], preferred_element_type=jnp.float32)
    z = z + b_ref[...]
    # LeakyReLU, PyTorch default negative_slope = 0.01
    act = jnp.where(z > 0, z, 0.01 * z)
    # Residual add in f32, single cast on store.
    o_ref[...] = (x.astype(jnp.float32) + act).astype(o_ref.dtype)


def residual_block(x, weight, bias, *, max_batch_tile=256):
    """x: (B, D); weight: (D, D) in PyTorch layout (out, in); bias: (D,)."""
    B, D = x.shape

    # Pad feature dim to a lane-dense multiple of 128; pad batch to the tile.
    Dp = _round_up(max(D, 128), 128)
    TB = min(max_batch_tile, _round_up(B, 8))
    Bp = _round_up(B, TB)

    x_p = jnp.pad(x, ((0, Bp - B), (0, Dp - D)))
    wt_p = jnp.pad(weight.T, ((0, Dp - D), (0, Dp - D)))          # (in, out)
    b_p = jnp.pad(bias.astype(jnp.float32), (0, Dp - D)).reshape(1, Dp)

    grid = (Bp // TB,)
    itemsize = jnp.dtype(x.dtype).itemsize
    cost = pl.CostEstimate(
        flops=2 * Bp * Dp * Dp,
        transcendentals=0,
        bytes_accessed=(Bp * Dp * itemsize            # x in
                        + Dp * Dp * wt_p.dtype.itemsize  # weight (once)
                        + Dp * 4                      # bias (once)
                        + Bp * Dp * itemsize),        # y out
    )

    out = pl.pallas_call(
        residual_block_kernel,
        out_shape=jax.ShapeDtypeStruct((Bp, Dp), x.dtype),
        grid_spec=pltpu.PrefetchScalarGridSpec(
            num_scalar_prefetch=0,
            grid=grid,
            in_specs=[
                pl.BlockSpec((TB, Dp), lambda i: (i, 0)),   # x: tiled over batch
                pl.BlockSpec((Dp, Dp), lambda i: (0, 0)),   # weight: resident
                pl.BlockSpec((1, Dp), lambda i: (0, 0)),    # bias: resident
            ],
            out_specs=pl.BlockSpec((TB, Dp), lambda i: (i, 0)),
        ),
        compiler_params=pltpu.CompilerParams(
            dimension_semantics=("parallel",)),
        cost_estimate=cost,
    )(x_p, wt_p, b_p)

    return out[:B, :D]


if __name__ == "__main__":
    key = jax.random.PRNGKey(0)
    k_x, k_w, k_b = jax.random.split(key, 3)

    B, D = 8, 32  # small shapes; wrapper pads D up to 128 lanes internally

    x = jax.random.normal(k_x, (B, D), dtype=jnp.float32)
    # Deterministic "Linear" params (PyTorch layout: weight (out, in), bias (out,))
    bound = 1.0 / jnp.sqrt(D)
    weight = jax.random.uniform(k_w, (D, D), minval=-bound, maxval=bound,
                                dtype=jnp.float32)
    bias = jax.random.uniform(k_b, (D,), minval=-bound, maxval=bound,
                              dtype=jnp.float32)

    out = residual_block(x, weight, bias)
    out = jax.block_until_ready(out)

    # Pure-JAX reference check of the forward semantics
    z_ref = x @ weight.T + bias
    ref = x + jnp.where(z_ref > 0, z_ref, 0.01 * z_ref)
    assert out.shape == ref.shape, "shape mismatch vs reference"
    assert jnp.allclose(out, ref, atol=1e-5, rtol=1e-5), "mismatch vs reference"

    print("KERNEL_OK")
</pallas_src>

<mosaic_0001>
module attributes {stable_mosaic.version = 11 : i64} {
  func.func @residual_block_kernel(%arg0: i32, %arg1: memref<8x128xf32, #tpu.memory_space<vmem>>, %arg2: memref<128x128xf32, #tpu.memory_space<vmem>>, %arg3: memref<1x128xf32, #tpu.memory_space<vmem>>, %arg4: memref<8x128xf32, #tpu.memory_space<vmem>>) attributes {dimension_semantics = [#tpu.dimension_semantics<parallel>], iteration_bounds = array<i64: 1>, scalar_prefetch = 0 : i64, scratch_operands = 0 : i64, tpu.core_type = #tpu.core_type<tc>, window_params = [{transform_indices = @transform_0, window_bounds = array<i64: 8, 128>}, {pipeline_mode = #tpu.pipeline_mode<synchronous>, transform_indices = @transform_1, window_bounds = array<i64: 128, 128>}, {pipeline_mode = #tpu.pipeline_mode<synchronous>, transform_indices = @transform_2, window_bounds = array<i64: 1, 128>}, {transform_indices = @transform_3, window_bounds = array<i64: 8, 128>}]} {
    %c0 = arith.constant 0 : index
    %c0_0 = arith.constant 0 : index
    %0 = vector.load %arg1[%c0, %c0_0] : memref<8x128xf32, #tpu.memory_space<vmem>>, vector<8x128xf32>
    %c0_1 = arith.constant 0 : index
    %c0_2 = arith.constant 0 : index
    %1 = vector.load %arg2[%c0_1, %c0_2] : memref<128x128xf32, #tpu.memory_space<vmem>>, vector<128x128xf32>
    %cst = arith.constant dense<0.000000e+00> : vector<8x128xf32>
    %2 = tpu.matmul %0, %1, %cst {dimension_numbers = #tpu.dot_dimension_numbers<[1], [0], [0], [1], [0, 0, 1, 1], [], []>} : vector<8x128xf32>, vector<128x128xf32>, vector<8x128xf32> -> vector<8x128xf32>
    %c0_3 = arith.constant 0 : index
    %c0_4 = arith.constant 0 : index
    %3 = vector.load %arg3[%c0_3, %c0_4] : memref<1x128xf32, #tpu.memory_space<vmem>>, vector<1x128xf32>
    %4 = vector.broadcast %3 : vector<1x128xf32> to vector<8x128xf32>
    %5 = arith.addf %2, %4 : vector<8x128xf32>
    %cst_5 = arith.constant 0.000000e+00 : f32
    %6 = vector.broadcast %cst_5 : f32 to vector<8x128xf32>
    %7 = arith.cmpf ogt, %5, %6 : vector<8x128xf32>
    %cst_6 = arith.constant 0.00999999977 : f32
    %8 = vector.broadcast %cst_6 : f32 to vector<8x128xf32>
    %9 = arith.mulf %8, %5 : vector<8x128xf32>
    %10 = arith.select %7, %5, %9 : vector<8x128xi1>, vector<8x128xf32>
    %11 = arith.addf %0, %10 : vector<8x128xf32>
    %c0_7 = arith.constant 0 : index
    %c0_8 = arith.constant 0 : index
    %12 = vector.load %arg4[%c0_7, %c0_8] : memref<8x128xf32, #tpu.memory_space<vmem>>, vector<8x128xf32>
    tpu.vector_store %arg4[%c0_7, %c0_8], %11 {strides = array<i32>} : memref<8x128xf32, #tpu.memory_space<vmem>>, vector<8x128xf32>,
    return
  }
  func.func @transform_0(%arg0: i32) -> (i32, i32) {
    %c0_i32 = arith.constant 0 : i32
    %c0_i32_0 = arith.constant 0 : i32
    return %arg0, %c0_i32 : i32, i32
  }
  func.func @transform_1(%arg0: i32) -> (i32, i32) {
    %c0_i32 = arith.constant 0 : i32
    %c0_i32_0 = arith.constant 0 : i32
    %c0_i32_1 = arith.constant 0 : i32
    return %c0_i32, %c0_i32_0 : i32, i32
  }
  func.func @transform_2(%arg0: i32) -> (i32, i32) {
    %c0_i32 = arith.constant 0 : i32
    %c0_i32_0 = arith.constant 0 : i32
    %c0_i32_1 = arith.constant 0 : i32
    return %c0_i32, %c0_i32_0 : i32, i32
  }
  func.func @transform_3(%arg0: i32) -> (i32, i32) {
    %c0_i32 = arith.constant 0 : i32
    %c0_i32_0 = arith.constant 0 : i32
    return %arg0, %c0_i32 : i32, i32
  }
}

</mosaic_0001>

<bundles_post_ra>
// kernel: tpu_custom_call.1
= control target key start
LH: loop header
LB: loop body
LE: loop exit
PB: predicated region body
PF: predicated region fallthrough
CT: control target
= control target key end

     0   :  { %8 = vsyncpa [#allocation3], 0  ;;  %s321_s0 = inlined_call_operand.hbm [shape: f32[8,128], index: 0, kind: input, shape index: {}]   ;;  %s322_s1 = inlined_call_operand.hbm [shape: f32[128,128], index: 1, kind: input, shape index: {}]   ;;  %s323_s2 = inlined_call_operand.vmem [shape: f32[1,128], index: 2, kind: input, shape index: {}]   ;;  %s324_s3 = inlined_call_operand.hbm [shape: f32[8,128], index: 3, kind: output, shape index: {}]  }
   0x1   :  { %9 = vsyncpa [#allocation6], 0 }
   0x2   :  { %10 = vsyncpa [#allocation4], 0  ;;  %s282_s12 = smov [#allocation2]   ;;  %s283_s14 = smov [#allocation5]  }
   0x3   :  { %s17_s13 = sshll.u32 %s282_s12, 4  ;;  %s26_s15 = sshll.u32 %s283_s14, 4  ;;  %s18_s13 = int_to_ptr.vmem [resolvable:$true] %s17_s13  ;;  %s27_s15 = int_to_ptr.vmem [resolvable:$true] %s26_s15 }
   0x4   :  { %s224_s16 = scalar_lea.vmem %s18_s13, 128  ;;  %p229_p1 = scmp.lt.s32.totalorder %s18_s13, %s18_s13 }
   0x5   :  { %p225_p0 = scmp.ne.s32.totalorder %s18_s13, %s224_s16  ;;  %p230_p2 = scmp.lt.s32.totalorder %s224_s16, %s224_s16 }
   0x7   :  { %p231_p3 = por %p230_p2, %p229_p1 }
   0x9   :  { %p232_p4 = pnand %p231_p3, %p225_p0 }
   0xb   :  { %235 = shalt.err (!%p232_p4)
}
   0xc   :  { %20 = dma.hbm_to_vmem [thread:$0]  %s321_s0, 128, %s18_s13, [#allocation3]  }
   0xd   :  { %s244_s19 = scalar_lea.vmem %s27_s15, 2048  ;;  %p249_p6 = scmp.lt.s32.totalorder %s27_s15, %s27_s15 }
   0xe   :  { %p245_p5 = scmp.ne.s32.totalorder %s27_s15, %s244_s19  ;;  %p250_p7 = scmp.lt.s32.totalorder %s244_s19, %s244_s19 }
  0x10   :  { %p251_p8 = por %p250_p7, %p249_p6 }
  0x12   :  { %p252_p9 = pnand %p251_p8, %p245_p5 }
  0x14   :  { %255 = shalt.err (!%p252_p9)
}
  0x15   :  { %s284_s20 = smov 128   ;;  %s285_s21 = smov 8  }
  0x16   :  { %32 = dma.hbm_to_vmem [thread:$0]  %s322_s1, 2048, %s27_s15, [#allocation6], %s284_s20, %s284_s20, %s285_s21  }
  0x17   :  { %276 = dma.done.wait [#allocation3], 128  }
  0x18   :  { %277 = vsyncadd [#allocation3], 4294967168 }
  0x19   :  { %278 = dma.done.wait [#allocation6], 2048  }
  0x1a   :  { %279 = vsyncadd [#allocation6], 4294965248  ;;  %v286_v0 = vmov 0.0   ;;  %vm287_vm0 = vmmov 0   ;;  %v57_v1 = vld [vmem:[#allocation5 + $0x78] sm:$0xff]  ;;  %v56_v2 = vld [vmem:[#allocation5 + $0x70] sm:$0xff] }
  0x1b   :  { %174 = vmatprep.subr.mxu0 %v286_v0  ;;  %206 = vmatprep.mubr.msk.f32.mxu0 %vm287_vm0, %v286_v0  ;;  %v55_v3 = vld [vmem:[#allocation5 + $0x68] sm:$0xff]  ;;  %v54_v4 = vld [vmem:[#allocation5 + $0x60] sm:$0xff]  ;;  %v53_v5 = vld [vmem:[#allocation5 + $0x58] sm:$0xff]  ;;  %s288_s24 = smov [#allocation7]  }
  0x1c   :  { %175 = vmatpush3.msra.mxu0 %v57_v1  ;;  %v52_v6 = vld [vmem:[#allocation5 + $0x50] sm:$0xff]  ;;  %v51_v7 = vld [vmem:[#allocation5 + $0x48] sm:$0xff]  ;;  %v50_v8 = vld [vmem:[#allocation5 + $0x40] sm:$0xff]  ;;  %s146_s25 = sshll.u32 %s288_s24, 4  ;;  %s147_s25 = int_to_ptr.vmem [resolvable:$true] %s146_s25 }
  0x1d   :  { %176 = vmatprep.subr.mxu0 %v286_v0  ;;  %v49_v9 = vld [vmem:[#allocation5 + $0x38] sm:$0xff]  ;;  %v48_v10 = vld [vmem:[#allocation5 + $0x30] sm:$0xff]  ;;  %v47_v11 = vld [vmem:[#allocation5 + $0x28] sm:$0xff]  ;;  %s256_s26 = scalar_lea.vmem %s147_s25, 128  ;;  %p261_p11 = scmp.lt.s32.totalorder %s147_s25, %s147_s25 }
  0x1e   :  { %177 = vmatpush3.msra.mxu0 %v56_v2  ;;  %v46_v12 = vld [vmem:[#allocation5 + $0x20] sm:$0xff]  ;;  %v45_v13 = vld [vmem:[#allocation5 + $0x18] sm:$0xff]  ;;  %v44_v14 = vld [vmem:[#allocation5 + $0x10] sm:$0xff]  ;;  %p257_p10 = scmp.ne.s32.totalorder %s147_s25, %s256_s26  ;;  %p262_p12 = scmp.lt.s32.totalorder %s256_s26, %s256_s26 }
  0x1f   :  { %178 = vmatprep.subr.mxu0 %v286_v0  ;;  %v43_v15 = vld [vmem:[#allocation5 + $0x8] sm:$0xff]  ;;  %v42_v16 = vld [vmem:[#allocation5] sm:$0xff]  ;;  %v41_v17 = vld [vmem:[#allocation2] sm:$0xff] }
  0x20   :  { %179 = vmatpush3.msra.mxu0 %v55_v3  ;;  %v156_v18 = vld [vmem:[%s323_s2] ss:$0 sm:$0xff]  ;;  %p263_p13 = por %p262_p12, %p261_p11 }
  0x21   :  { %180 = vmatprep.subr.mxu0 %v286_v0 }
  0x22   :  { %181 = vmatpush3.msra.mxu0 %v54_v4  ;;  %p264_p0 = pnand %p263_p13, %p257_p10 }
  0x23   :  { %182 = vmatprep.subr.mxu0 %v286_v0 }
  0x24   :  { %183 = vmatpush3.msra.mxu0 %v53_v5 }
  0x25   :  { %184 = vmatprep.subr.mxu0 %v286_v0 }
  0x26   :  { %185 = vmatpush3.msra.mxu0 %v52_v6 }
  0x27   :  { %186 = vmatprep.subr.mxu0 %v286_v0 }
  0x28   :  { %187 = vmatpush3.msra.mxu0 %v51_v7 }
  0x29   :  { %188 = vmatprep.subr.mxu0 %v286_v0 }
  0x2a   :  { %189 = vmatpush3.msra.mxu0 %v50_v8 }
  0x2b   :  { %190 = vmatprep.subr.mxu0 %v286_v0 }
  0x2c   :  { %191 = vmatpush3.msra.mxu0 %v49_v9 }
  0x2d   :  { %192 = vmatprep.subr.mxu0 %v286_v0 }
  0x2e   :  { %193 = vmatpush3.msra.mxu0 %v48_v10 }
  0x2f   :  { %194 = vmatprep.subr.mxu0 %v286_v0 }
  0x30   :  { %195 = vmatpush3.msra.mxu0 %v47_v11 }
  0x31   :  { %196 = vmatprep.subr.mxu0 %v286_v0 }
  0x32   :  { %197 = vmatpush3.msra.mxu0 %v46_v12 }
  0x33   :  { %198 = vmatprep.subr.mxu0 %v286_v0 }
  0x34   :  { %199 = vmatpush3.msra.mxu0 %v45_v13 }
  0x35   :  { %200 = vmatprep.subr.mxu0 %v286_v0 }
  0x36   :  { %201 = vmatpush3.msra.mxu0 %v44_v14 }
  0x37   :  { %202 = vmatprep.subr.mxu0 %v286_v0 }
  0x38   :  { %203 = vmatpush3.msra.mxu0 %v43_v15 }
  0x39   :  { %204 = vmatprep.subr.mxu0 %v286_v0 }
  0x3a   :  { %205 = vmatpush3.msra.mxu0 %v42_v16 }
  0x3b   :  { %207 = vmatmul.mubr.f32.vlgmr.msra.gmra.mxu0 %v41_v17 }
  0xfb   :  { %v131_v19 = vpop.f32.mrf.mxu0 }
  0xfc   :  { %v132_v20 = vadd.f32 %v156_v18, %v131_v19 }
  0xfd   :  { %v208_v21 = vpop.f32.mrf.mxu0 }
  0xfe   :  { %vm135_vm1 = vcmp.gt.f32.partialorder %v132_v20, 0.0  ;;  %v136_v22 = vmul.f32 0.01, %v132_v20 }
 0x100   :  { %v137_v23 = vsel %vm135_vm1, %v132_v20, %v136_v22 }
 0x101   :  { %v138_v24 = vadd.f32 %v137_v23, %v41_v17 }
 0x103   :  { %139 = vst [vmem:[#allocation7] sm:$0xff] %v138_v24 }
 0x104   :  { %267 = shalt.err (!%p264_p0)
}
 0x105   :  { %149 = dma.vmem_to_hbm [thread:$0]  %s147_s25, 128, %s324_s3, [#allocation4]  }
 0x106   :  { %280 = dma.done.wait [#allocation4], 128  }
 0x107   :  { %281 = vsyncadd [#allocation4], 4294967168 }
 0x108   :  { %153 = vsyncpa [#allocation3], 1 }
 0x109   :  { %154 = vsyncpa [#allocation6], 1 }
 0x10a   :  { %155 = vsyncpa [#allocation4], 1 }

</bundles_post_ra>
